<compile_context>
chip_gen: v5e
topology: v5e:2x2
jax: 0.10.0
libtpu: 0.0.40
codegen_flags: <defaults>
</compile_context>

<pallas_src>
import functools

import jax
import jax.numpy as jnp
from jax import lax
from jax.experimental import pallas as pl
from jax.experimental.pallas import tpu as pltpu

BN_EPS = 1e-5


def _round_up(x, m):
    return ((x + m - 1) // m) * m


# --------------------------------------------------------------------------- #
# Kernel
# --------------------------------------------------------------------------- #
def _mlp_kernel(x_ref, w1_ref, b1_ref, w2_ref, b2_ref, w3_ref, b3_ref, o_ref,
                *, approx_recip):
    cdt = w1_ref.dtype  # MXU compute dtype (f32 or bf16); accumulation is f32.

    # In-kernel cast of the activations (cheap VPU work, hidden under DMA).
    x = x_ref[...].astype(cdt)

    # ---- fc1 (BN1 folded into w1/b1) + relu ----
    h = jnp.dot(x, w1_ref[...], preferred_element_type=jnp.float32) + b1_ref[...]
    h = jnp.maximum(h, 0.0)
    # dropout (p=0.3) -> identity in eval mode

    # ---- fc2 (BN2 folded into w2/b2) + relu ----
    h = jnp.dot(h.astype(cdt), w2_ref[...],
                preferred_element_type=jnp.float32) + b2_ref[...]
    h = jnp.maximum(h, 0.0)
    # dropout (p=0.3) -> identity in eval mode

    # ---- fc3 + sigmoid ----
    logits = jnp.dot(h.astype(cdt), w3_ref[...],
                     preferred_element_type=jnp.float32) + b3_ref[...]
    o_ref[...] = pl.reciprocal(1.0 + jnp.exp(-logits),
                               approx=approx_recip).astype(o_ref.dtype)


# --------------------------------------------------------------------------- #
# One-time parameter preparation (hoisted out of the per-call path)
# --------------------------------------------------------------------------- #
def fold_and_pack_params(params, *, compute_dtype=jnp.bfloat16):
    """Fold BatchNorm running stats + Linear biases into (w, b) pairs, pad the
    hidden (N/K) dims to 128 lanes, and cast weights to the MXU compute dtype.

    Call once; reuse the result across forward calls."""
    s1 = params["bn1_gamma"] * lax.rsqrt(params["bn1_var"] + BN_EPS)
    w1 = params["w1"] * s1[None, :]
    b1 = (params["b1"] - params["bn1_mean"]) * s1 + params["bn1_beta"]

    s2 = params["bn2_gamma"] * lax.rsqrt(params["bn2_var"] + BN_EPS)
    w2 = params["w2"] * s2[None, :]
    b2 = (params["b2"] - params["bn2_mean"]) * s2 + params["bn2_beta"]

    w3, b3 = params["w3"], params["b3"]

    D_in, H1 = w1.shape
    H2 = w2.shape[1]
    D_out = w3.shape[1]
    H1p, H2p = _round_up(H1, 128), _round_up(H2, 128)

    def pad2(a, r, c):
        return jnp.pad(a, ((0, r - a.shape[0]), (0, c - a.shape[1])))

    def pad_row(v, c):
        return jnp.pad(v, (0, c - v.shape[0])).reshape(1, c)

    # Zero-padded hidden lanes contribute exactly zero through relu/matmuls,
    # so the math is unchanged.  D_in and D_out are NOT padded.
    return {
        "w1": pad2(w1, D_in, H1p).astype(compute_dtype),
        "b1": pad_row(b1, H1p).astype(jnp.float32),
        "w2": pad2(w2, H1p, H2p).astype(compute_dtype),
        "b2": pad_row(b2, H2p).astype(jnp.float32),
        "w3": pad2(w3, H2p, D_out).astype(compute_dtype),
        "b3": b3.reshape(1, D_out).astype(jnp.float32),
    }


# --------------------------------------------------------------------------- #
# Forward
# --------------------------------------------------------------------------- #
def multilabel_classifier_forward(x, packed, *, tile_b=None, out_dtype=None,
                                  vmem_limit_bytes=None, approx_sigmoid=True):
    """x: [B, input_dim] float32.  packed: output of fold_and_pack_params()."""
    B, D_in = x.shape
    w1, b1 = packed["w1"], packed["b1"]
    w2, b2 = packed["w2"], packed["b2"]
    w3, b3 = packed["w3"], packed["b3"]
    assert w1.shape[0] == D_in, "input_dim mismatch with packed params"
    H1p, H2p, D_out = w1.shape[1], w2.shape[1], w3.shape[1]

    compute_dtype = w1.dtype
    if out_dtype is None:
        out_dtype = compute_dtype  # narrow writeback by default

    # ---- batch tiling: no batch padding; ragged last block is masked. ----
    gran = 8 if jnp.dtype(compute_dtype).itemsize >= 4 else 16  # bf16 packs 16 rows/vreg
    if tile_b is None:
        tile_b = 512
    tile_b = max(gran, _round_up(tile_b, gran))
    if B > gran:
        # >=2 grid steps when the batch allows it: v7x megacore sharding of the
        # "parallel" batch axis + prefetch/writeback overlap on all generations.
        tile_b = min(tile_b, _round_up(pl.cdiv(B, 2), gran))
    tile_b = min(tile_b, _round_up(B, gran))
    grid = pl.cdiv(B, tile_b)

    full = lambda shape: pl.BlockSpec(shape, lambda i: (0, 0))  # loop-invariant

    grid_spec = pltpu.PrefetchScalarGridSpec(
        num_scalar_prefetch=0,
        grid=(grid,),
        in_specs=[
            pl.BlockSpec((tile_b, D_in), lambda i: (i, 0)),  # x tile (full-dim lanes)
            full((D_in, H1p)), full((1, H1p)),
            full((H1p, H2p)), full((1, H2p)),
            full((H2p, D_out)), full((1, D_out)),
        ],
        out_specs=pl.BlockSpec((tile_b, D_out), lambda i: (i, 0)),
    )

    compiler_kwargs = dict(dimension_semantics=("parallel",))
    if vmem_limit_bytes is not None:
        compiler_kwargs["vmem_limit_bytes"] = vmem_limit_bytes

    kernel = functools.partial(_mlp_kernel, approx_recip=approx_sigmoid)
    fn = pl.pallas_call(
        kernel,
        out_shape=jax.ShapeDtypeStruct((B, D_out), out_dtype),
        grid_spec=grid_spec,
        compiler_params=pltpu.CompilerParams(**compiler_kwargs),
    )
    return fn(x, w1, b1, w2, b2, w3, b3)


# --------------------------------------------------------------------------- #
# Parameter init + pure-JAX reference
# --------------------------------------------------------------------------- #
def init_params(key, input_dim, hidden_dim1, hidden_dim2, output_dim):
    ks = jax.random.split(key, 14)

    def lin(kw, kb, fan_in, fan_out):
        bound = 1.0 / jnp.sqrt(fan_in)
        w = jax.random.uniform(kw, (fan_in, fan_out), jnp.float32, -bound, bound)
        b = jax.random.uniform(kb, (fan_out,), jnp.float32, -bound, bound)
        return w, b

    w1, b1 = lin(ks[0], ks[1], input_dim, hidden_dim1)
    w2, b2 = lin(ks[2], ks[3], hidden_dim1, hidden_dim2)
    w3, b3 = lin(ks[4], ks[5], hidden_dim2, output_dim)

    def bn_stats(kg, kb, km, kv, dim):
        gamma = jax.random.uniform(kg, (dim,), jnp.float32, 0.5, 1.5)
        beta = 0.1 * jax.random.normal(kb, (dim,), jnp.float32)
        mean = 0.1 * jax.random.normal(km, (dim,), jnp.float32)
        var = jax.random.uniform(kv, (dim,), jnp.float32, 0.5, 1.5)
        return gamma, beta, mean, var

    g1, be1, m1, v1 = bn_stats(ks[6], ks[7], ks[8], ks[9], hidden_dim1)
    g2, be2, m2, v2 = bn_stats(ks[10], ks[11], ks[12], ks[13], hidden_dim2)

    return {
        "w1": w1, "b1": b1,
        "bn1_gamma": g1, "bn1_beta": be1, "bn1_mean": m1, "bn1_var": v1,
        "w2": w2, "b2": b2,
        "bn2_gamma": g2, "bn2_beta": be2, "bn2_mean": m2, "bn2_var": v2,
        "w3": w3, "b3": b3,
    }


def reference_forward(x, p):
    def bn(h, g, b, m, v):
        return g * (h - m) / jnp.sqrt(v + BN_EPS) + b
    h = jnp.maximum(bn(x @ p["w1"] + p["b1"],
                       p["bn1_gamma"], p["bn1_beta"], p["bn1_mean"], p["bn1_var"]), 0.0)
    h = jnp.maximum(bn(h @ p["w2"] + p["b2"],
                       p["bn2_gamma"], p["bn2_beta"], p["bn2_mean"], p["bn2_var"]), 0.0)
    logits = h @ p["w3"] + p["b3"]
    return 1.0 / (1.0 + jnp.exp(-logits))


if __name__ == "__main__":
    key = jax.random.PRNGKey(0)
    k_x1, k_x2, k_x3, k_p = jax.random.split(key, 4)

    input_dim, hidden_dim1, hidden_dim2, output_dim = 32, 64, 32, 16
    params = init_params(k_p, input_dim, hidden_dim1, hidden_dim2, output_dim)

    packed_f32 = fold_and_pack_params(params, compute_dtype=jnp.float32)
    packed_bf16 = fold_and_pack_params(params, compute_dtype=jnp.bfloat16)

    # Case 1: f32 compute, exact reciprocal -> tight tolerance.
    x1 = jax.random.normal(k_x1, (8, input_dim), jnp.float32)
    out1 = jax.block_until_ready(
        multilabel_classifier_forward(x1, packed_f32, approx_sigmoid=False))
    ref1 = reference_forward(x1, params)
    assert out1.shape == (8, output_dim)
    assert jnp.allclose(out1, ref1, atol=1e-4, rtol=1e-4), \
        float(jnp.max(jnp.abs(out1 - ref1)))

    # Case 2: ragged batch, bf16 MXU compute + bf16 output + approx sigmoid.
    x2 = jax.random.normal(k_x2, (13, input_dim), jnp.float32)
    out2 = jax.block_until_ready(
        multilabel_classifier_forward(x2, packed_bf16))
    ref2 = reference_forward(x2, params)
    assert out2.shape == (13, output_dim)
    assert jnp.allclose(out2.astype(jnp.float32), ref2, atol=3e-2, rtol=3e-2), \
        float(jnp.max(jnp.abs(out2.astype(jnp.float32) - ref2)))

    # Case 3: multi-step grid with a ragged last block (B=40 -> tile_b=24, 2 steps),
    # f32 compute + approx-EUP sigmoid.
    x3 = jax.random.normal(k_x3, (40, input_dim), jnp.float32)
    out3 = jax.block_until_ready(
        multilabel_classifier_forward(x3, packed_f32))
    ref3 = reference_forward(x3, params)
    assert out3.shape == (40, output_dim)
    assert jnp.allclose(out3, ref3, atol=5e-3, rtol=5e-3), \
        float(jnp.max(jnp.abs(out3 - ref3)))

    print("KERNEL_OK")
</pallas_src>

<mosaic_0001>
module attributes {stable_mosaic.version = 11 : i64} {
  func.func @_mlp_kernel(%arg0: i32, %arg1: memref<8x32xf32, #tpu.memory_space<vmem>>, %arg2: memref<32x128xf32, #tpu.memory_space<vmem>>, %arg3: memref<1x128xf32, #tpu.memory_space<vmem>>, %arg4: memref<128x128xf32, #tpu.memory_space<vmem>>, %arg5: memref<1x128xf32, #tpu.memory_space<vmem>>, %arg6: memref<128x16xf32, #tpu.memory_space<vmem>>, %arg7: memref<1x16xf32, #tpu.memory_space<vmem>>, %arg8: memref<8x16xf32, #tpu.memory_space<vmem>>) attributes {dimension_semantics = [#tpu.dimension_semantics<parallel>], iteration_bounds = array<i64: 1>, scalar_prefetch = 0 : i64, scratch_operands = 0 : i64, tpu.core_type = #tpu.core_type<tc>, window_params = [{transform_indices = @transform_0, window_bounds = array<i64: 8, 32>}, {pipeline_mode = #tpu.pipeline_mode<synchronous>, transform_indices = @transform_1, window_bounds = array<i64: 32, 128>}, {pipeline_mode = #tpu.pipeline_mode<synchronous>, transform_indices = @transform_2, window_bounds = array<i64: 1, 128>}, {pipeline_mode = #tpu.pipeline_mode<synchronous>, transform_indices = @transform_3, window_bounds = array<i64: 128, 128>}, {pipeline_mode = #tpu.pipeline_mode<synchronous>, transform_indices = @transform_4, window_bounds = array<i64: 1, 128>}, {pipeline_mode = #tpu.pipeline_mode<synchronous>, transform_indices = @transform_5, window_bounds = array<i64: 128, 16>}, {pipeline_mode = #tpu.pipeline_mode<synchronous>, transform_indices = @transform_6, window_bounds = array<i64: 1, 16>}, {transform_indices = @transform_7, window_bounds = array<i64: 8, 16>}]} {
    %c0 = arith.constant 0 : index
    %c0_0 = arith.constant 0 : index
    %0 = vector.load %arg1[%c0, %c0_0] : memref<8x32xf32, #tpu.memory_space<vmem>>, vector<8x32xf32>
    %c0_1 = arith.constant 0 : index
    %c0_2 = arith.constant 0 : index
    %1 = vector.load %arg2[%c0_1, %c0_2] : memref<32x128xf32, #tpu.memory_space<vmem>>, vector<32x128xf32>
    %cst = arith.constant dense<0.000000e+00> : vector<8x128xf32>
    %2 = tpu.matmul %0, %1, %cst {dimension_numbers = #tpu.dot_dimension_numbers<[1], [0], [0], [1], [0, 0, 1, 1], [], []>} : vector<8x32xf32>, vector<32x128xf32>, vector<8x128xf32> -> vector<8x128xf32>
    %c0_3 = arith.constant 0 : index
    %c0_4 = arith.constant 0 : index
    %3 = vector.load %arg3[%c0_3, %c0_4] : memref<1x128xf32, #tpu.memory_space<vmem>>, vector<1x128xf32>
    %4 = vector.broadcast %3 : vector<1x128xf32> to vector<8x128xf32>
    %5 = arith.addf %2, %4 : vector<8x128xf32>
    %cst_5 = arith.constant 0.000000e+00 : f32
    %6 = vector.broadcast %cst_5 : f32 to vector<8x128xf32>
    %7 = arith.maximumf %5, %6 : vector<8x128xf32>
    %c0_6 = arith.constant 0 : index
    %c0_7 = arith.constant 0 : index
    %8 = vector.load %arg4[%c0_6, %c0_7] : memref<128x128xf32, #tpu.memory_space<vmem>>, vector<128x128xf32>
    %cst_8 = arith.constant dense<0.000000e+00> : vector<8x128xf32>
    %9 = tpu.matmul %7, %8, %cst_8 {dimension_numbers = #tpu.dot_dimension_numbers<[1], [0], [0], [1], [0, 0, 1, 1], [], []>} : vector<8x128xf32>, vector<128x128xf32>, vector<8x128xf32> -> vector<8x128xf32>
    %c0_9 = arith.constant 0 : index
    %c0_10 = arith.constant 0 : index
    %10 = vector.load %arg5[%c0_9, %c0_10] : memref<1x128xf32, #tpu.memory_space<vmem>>, vector<1x128xf32>
    %11 = vector.broadcast %10 : vector<1x128xf32> to vector<8x128xf32>
    %12 = arith.addf %9, %11 : vector<8x128xf32>
    %cst_11 = arith.constant 0.000000e+00 : f32
    %13 = vector.broadcast %cst_11 : f32 to vector<8x128xf32>
    %14 = arith.maximumf %12, %13 : vector<8x128xf32>
    %c0_12 = arith.constant 0 : index
    %c0_13 = arith.constant 0 : index
    %15 = vector.load %arg6[%c0_12, %c0_13] : memref<128x16xf32, #tpu.memory_space<vmem>>, vector<128x16xf32>
    %cst_14 = arith.constant dense<0.000000e+00> : vector<8x16xf32>
    %16 = tpu.matmul %14, %15, %cst_14 {dimension_numbers = #tpu.dot_dimension_numbers<[1], [0], [0], [1], [0, 0, 1, 1], [], []>} : vector<8x128xf32>, vector<128x16xf32>, vector<8x16xf32> -> vector<8x16xf32>
    %c0_15 = arith.constant 0 : index
    %c0_16 = arith.constant 0 : index
    %17 = vector.load %arg7[%c0_15, %c0_16] : memref<1x16xf32, #tpu.memory_space<vmem>>, vector<1x16xf32>
    %18 = vector.broadcast %17 : vector<1x16xf32> to vector<8x16xf32>
    %19 = arith.addf %16, %18 : vector<8x16xf32>
    %cst_17 = arith.constant 0.000000e+00 : f32
    %20 = vector.broadcast %cst_17 : f32 to vector<8x16xf32>
    %21 = arith.subf %20, %19 : vector<8x16xf32>
    %22 = math.exp %21 : vector<8x16xf32>
    %cst_18 = arith.constant 1.000000e+00 : f32
    %23 = vector.broadcast %cst_18 : f32 to vector<8x16xf32>
    %24 = arith.addf %23, %22 : vector<8x16xf32>
    %25 = tpu.reciprocal %24 : vector<8x16xf32> -> vector<8x16xf32>
    %c0_19 = arith.constant 0 : index
    %c0_20 = arith.constant 0 : index
    %26 = vector.load %arg8[%c0_19, %c0_20] : memref<8x16xf32, #tpu.memory_space<vmem>>, vector<8x16xf32>
    tpu.vector_store %arg8[%c0_19, %c0_20], %25 {strides = array<i32>} : memref<8x16xf32, #tpu.memory_space<vmem>>, vector<8x16xf32>,
    return
  }
  func.func @transform_0(%arg0: i32) -> (i32, i32) {
    %c0_i32 = arith.constant 0 : i32
    %c0_i32_0 = arith.constant 0 : i32
    return %arg0, %c0_i32 : i32, i32
  }
  func.func @transform_1(%arg0: i32) -> (i32, i32) {
    %c0_i32 = arith.constant 0 : i32
    %c0_i32_0 = arith.constant 0 : i32
    %c0_i32_1 = arith.constant 0 : i32
    return %c0_i32, %c0_i32_0 : i32, i32
  }
  func.func @transform_2(%arg0: i32) -> (i32, i32) {
    %c0_i32 = arith.constant 0 : i32
    %c0_i32_0 = arith.constant 0 : i32
    %c0_i32_1 = arith.constant 0 : i32
    return %c0_i32, %c0_i32_0 : i32, i32
  }
  func.func @transform_3(%arg0: i32) -> (i32, i32) {
    %c0_i32 = arith.constant 0 : i32
    %c0_i32_0 = arith.constant 0 : i32
    %c0_i32_1 = arith.constant 0 : i32
    return %c0_i32, %c0_i32_0 : i32, i32
  }
  func.func @transform_4(%arg0: i32) -> (i32, i32) {
    %c0_i32 = arith.constant 0 : i32
    %c0_i32_0 = arith.constant 0 : i32
    %c0_i32_1 = arith.constant 0 : i32
    return %c0_i32, %c0_i32_0 : i32, i32
  }
  func.func @transform_5(%arg0: i32) -> (i32, i32) {
    %c0_i32 = arith.constant 0 : i32
    %c0_i32_0 = arith.constant 0 : i32
    %c0_i32_1 = arith.constant 0 : i32
    return %c0_i32, %c0_i32_0 : i32, i32
  }
  func.func @transform_6(%arg0: i32) -> (i32, i32) {
    %c0_i32 = arith.constant 0 : i32
    %c0_i32_0 = arith.constant 0 : i32
    %c0_i32_1 = arith.constant 0 : i32
    return %c0_i32, %c0_i32_0 : i32, i32
  }
  func.func @transform_7(%arg0: i32) -> (i32, i32) {
    %c0_i32 = arith.constant 0 : i32
    %c0_i32_0 = arith.constant 0 : i32
    return %arg0, %c0_i32 : i32, i32
  }
}

</mosaic_0001>

<bundles_post_ra>
// kernel: tpu_custom_call.1
= control target key start
LH: loop header
LB: loop body
LE: loop exit
PB: predicated region body
PF: predicated region fallthrough
CT: control target
= control target key end

     0   :  { %12 = vsyncpa [#allocation3], 0  ;;  %s417_s0 = inlined_call_operand.vmem [shape: f32[8,32], index: 0, kind: input, shape index: {}]   ;;  %s418_s1 = inlined_call_operand.hbm [shape: f32[32,128], index: 1, kind: input, shape index: {}]   ;;  %s419_s2 = inlined_call_operand.vmem [shape: f32[1,128], index: 2, kind: input, shape index: {}]   ;;  %s420_s3 = inlined_call_operand.vmem [shape: f32[128,128], index: 3, kind: input, shape index: {}]   ;;  %s421_s4 = inlined_call_operand.vmem [shape: f32[1,128], index: 4, kind: input, shape index: {}]   ;;  %s422_s5 = inlined_call_operand.vmem [shape: f32[128,16], index: 5, kind: input, shape index: {}]   ;;  %s423_s6 = inlined_call_operand.vmem [shape: f32[1,16], index: 6, kind: input, shape index: {}]   ;;  %s424_s7 = inlined_call_operand.hbm [shape: f32[8,16], index: 7, kind: output, shape index: {}]  }
   0x1   :  { %13 = vsyncpa [#allocation4], 0  ;;  %s20_s26 = sshll.u32 %s418_s1, 4  ;;  %s259_s27 = smov [#allocation2]   ;;  %s21_s26 = int_to_ptr.hbm [resolvable:$true] %s20_s26 }
   0x2   :  { %s22_s28 = sshll.u32 %s259_s27, 4  ;;  %s260_s29 = smov 128   ;;  %s23_s28 = int_to_ptr.vmem [resolvable:$true] %s22_s28 }
   0x3   :  { %s261_s30 = smov 8  }
   0x4   :  { %28 = dma.hbm_to_vmem [thread:$0]  %s21_s26, 512, %s23_s28, [#allocation3], %s260_s29, %s260_s29, %s261_s30  }
   0x5   :  { %255 = dma.done.wait [#allocation3], 512  }
   0x6   :  { %256 = vsyncadd [#allocation3], 4294966784  ;;  %v47_v0 = vld [vmem:[#allocation2 + $0x18] sm:$0xff]  ;;  %v46_v1 = vld [vmem:[#allocation2 + $0x10] sm:$0xff]  ;;  %vm52_vm0 = vcmask 261120   ;;  %vm176_vm4 = vcmask 130048  }
   0x7   :  { %68 = vmatpush.msra.mxu0 %v47_v0  ;;  %v92_v2 = vld [vmem:[%s420_s3 + $0x78] sm:$0xff]  ;;  %v45_v3 = vld [vmem:[#allocation2 + $0x8] sm:$0xff]  ;;  %v91_v4 = vld [vmem:[%s420_s3 + $0x70] sm:$0xff] }
   0x8   :  { %97 = vmatpush.msra.mxu1 %v92_v2  ;;  %v90_v5 = vld [vmem:[%s420_s3 + $0x68] sm:$0xff]  ;;  %v44_v6 = vld [vmem:[#allocation2] sm:$0xff]  ;;  %v88_v9 = vld [vmem:[%s420_s3 + $0x58] sm:$0xff] }
   0x9   :  { %69 = vmatpush.msra.mxu0 %v46_v1  ;;  %v43_v7 = vld [vmem:[%s417_s0] sm:$0xff]  ;;  %v87_v10 = vld [vmem:[%s420_s3 + $0x50] sm:$0xff]  ;;  %v86_v11 = vld [vmem:[%s420_s3 + $0x48] sm:$0xff] }
   0xa   :  { %98 = vmatpush.msra.mxu1 %v91_v4  ;;  %v89_v8 = vld [vmem:[%s420_s3 + $0x60] sm:$0xff]  ;;  %v84_v13 = vld [vmem:[%s420_s3 + $0x38] sm:$0xff]  ;;  %v83_v14 = vld [vmem:[%s420_s3 + $0x30] sm:$0xff] }
   0xb   :  { %70 = vmatpush.msra.mxu0 %v45_v3  ;;  %v85_v12 = vld [vmem:[%s420_s3 + $0x40] sm:$0xff]  ;;  %v82_v15 = vld [vmem:[%s420_s3 + $0x28] sm:$0xff]  ;;  %v80_v17 = vld [vmem:[%s420_s3 + $0x18] sm:$0xff] }
   0xc   :  { %99 = vmatpush.msra.mxu1 %v90_v5  ;;  %v81_v16 = vld [vmem:[%s420_s3 + $0x20] sm:$0xff]  ;;  %v79_v18 = vld [vmem:[%s420_s3 + $0x10] sm:$0xff]  ;;  %v78_v19 = vld [vmem:[%s420_s3 + $0x8] sm:$0xff] }
   0xd   :  { %71 = vmatpush.msra.mxu0 %v44_v6  ;;  %v77_v20 = vld [vmem:[%s420_s3] sm:$0xff]  ;;  %v133_v21 = vld [vmem:[%s422_s5 + $0x78] sm:$0xff]  ;;  %v132_v22 = vld [vmem:[%s422_s5 + $0x70] sm:$0xff] }
   0xe   :  { %195 = vmatmul.msk.f32.vlgmr.msra.gmra.mxu0 %vm52_vm0, %v43_v7  ;;  %100 = vmatpush.msra.mxu1 %v89_v8  ;;  %v131_v23 = vld [vmem:[%s422_s5 + $0x68] sm:$0xff]  ;;  %v130_v24 = vld [vmem:[%s422_s5 + $0x60] sm:$0xff]  ;;  %v129_v25 = vld [vmem:[%s422_s5 + $0x58] sm:$0xff] }
   0xf   :  { %138 = vmatpush.msra.mxu2 %v133_v21  ;;  %v128_v26 = vld [vmem:[%s422_s5 + $0x50] sm:$0xff]  ;;  %v127_v27 = vld [vmem:[%s422_s5 + $0x48] sm:$0xff]  ;;  %v126_v28 = vld [vmem:[%s422_s5 + $0x40] sm:$0xff] }
  0x10   :  { %101 = vmatpush.msra.mxu1 %v88_v9  ;;  %v125_v29 = vld [vmem:[%s422_s5 + $0x38] sm:$0xff]  ;;  %v124_v30 = vld [vmem:[%s422_s5 + $0x30] sm:$0xff]  ;;  %v123_v31 = vld [vmem:[%s422_s5 + $0x28] sm:$0xff] }
  0x11   :  { %139 = vmatpush.msra.mxu2 %v132_v22  ;;  %v122_v32 = vld [vmem:[%s422_s5 + $0x20] sm:$0xff]  ;;  %v121_v33 = vld [vmem:[%s422_s5 + $0x18] sm:$0xff]  ;;  %v120_v38 = vld [vmem:[%s422_s5 + $0x10] sm:$0xff] }
  0x12   :  { %102 = vmatpush.msra.mxu1 %v87_v10  ;;  %v200_v34 = vld [vmem:[%s419_s2] ss:$0 sm:$0xff]  ;;  %v119_v39 = vld [vmem:[%s422_s5 + $0x8] sm:$0xff] }
  0x13   :  { %140 = vmatpush.msra.mxu2 %v131_v23  ;;  %v118_v40 = vld [vmem:[%s422_s5] sm:$0xff] }
  0x14   :  { %103 = vmatpush.msra.mxu1 %v86_v11  ;;  %v201_v41 = vld [vmem:[%s421_s4] ss:$0 sm:$0xff]  ;;  %s262_s4 = smov [#allocation5]  }
  0x15   :  { %141 = vmatpush.msra.mxu2 %v130_v24  ;;  %v202_v45 = vld [vmem:[%s423_s6] ss:$0 sm:$0xff]  ;;  %s183_s5 = sshll.u32 %s262_s4, 4  ;;  %s185_s6 = sshll.u32 %s424_s7, 4  ;;  %s184_s5 = int_to_ptr.vmem [resolvable:$true] %s183_s5  ;;  %s186_s6 = int_to_ptr.hbm [resolvable:$true] %s185_s6 }
  0x16   :  { %104 = vmatpush.msra.mxu1 %v85_v12 }
  0x17   :  { %142 = vmatpush.msra.mxu2 %v129_v25 }
  0x18   :  { %105 = vmatpush.msra.mxu1 %v84_v13 }
  0x19   :  { %143 = vmatpush.msra.mxu2 %v128_v26 }
  0x1a   :  { %106 = vmatpush.msra.mxu1 %v83_v14 }
  0x1b   :  { %144 = vmatpush.msra.mxu2 %v127_v27 }
  0x1c   :  { %107 = vmatpush.msra.mxu1 %v82_v15 }
  0x1d   :  { %145 = vmatpush.msra.mxu2 %v126_v28 }
  0x1e   :  { %108 = vmatpush.msra.mxu1 %v81_v16 }
  0x1f   :  { %146 = vmatpush.msra.mxu2 %v125_v29 }
  0x20   :  { %109 = vmatpush.msra.mxu1 %v80_v17 }
  0x21   :  { %147 = vmatpush.msra.mxu2 %v124_v30 }
  0x22   :  { %110 = vmatpush.msra.mxu1 %v79_v18 }
  0x23   :  { %148 = vmatpush.msra.mxu2 %v123_v31 }
  0x24   :  { %111 = vmatpush.msra.mxu1 %v78_v19 }
  0x25   :  { %149 = vmatpush.msra.mxu2 %v122_v32 }
  0x26   :  { %112 = vmatpush.msra.mxu1 %v77_v20 }
  0x27   :  { %150 = vmatpush.msra.mxu2 %v121_v33 }
  0x29   :  { %151 = vmatpush.msra.mxu2 %v120_v38 }
  0x2b   :  { %152 = vmatpush.msra.mxu2 %v119_v39 }
  0x2d   :  { %153 = vmatpush.msra.mxu2 %v118_v40 }
  0x8b   :  { %v73_v35 = vpop.f32.mrf.mxu0 }
  0x8c   :  { %v74_v36 = vadd.f32 %v200_v34, %v73_v35 }
  0x8e   :  { %v76_v37 = vmax.f32 %v74_v36, 0.0 }
  0x90   :  { %113 = vmatmul.f32.vlgmr.msra.gmra.mxu1 %v76_v37 }
 0x10d   :  { %v114_v42 = vpop.f32.mrf.mxu1 }
 0x10e   :  { %v115_v43 = vadd.f32 %v201_v41, %v114_v42 }
 0x110   :  { %v117_v44 = vmax.f32 %v115_v43, 0.0 }
 0x112   :  { %154 = vmatmul.f32.vlgmr.msra.gmra.mxu2 %v117_v44 }
 0x195   :  { %v155_v46 = vpop.f32.mrf.mxu2 }
 0x196   :  { %v156_v47 = vadd.f32 %v202_v45, %v155_v46 }
 0x198   :  { %v158_v48 = vsub.f32 0.0, %v156_v47 }
 0x19a   :  { %v159_v49 = vmul.f32 1.442695, %v158_v48 }
 0x19c   :  { %203 = vpow2.f32 %v159_v49 }
 0x1a2   :  { %v204_v50 = vpop.eup %203 }
 0x1a3   :  { %v161_v51 = vadd.f32 1.0, %v204_v50 }
 0x1a5   :  { %205 = vrcp.f32 %v161_v51  ;;  %v173_v55 = vand.u32 2147483648, %v161_v51  ;;  %v171_v57 = vand.u32 2147483647, %v161_v51  ;;  %vm167_vm2 = vweird.f32 %v161_v51 }
 0x1a7   :  { %v174_v59 = vor.u32 1.1754944e-38, %v173_v55  ;;  %vm172_vm5 = vcmp.eq.f32.partialorder %v171_v57, 8.507059e+37 }
 0x1ab   :  { %v206_v52 = vpop.eup %205 }
 0x1ac   :  { %v163_v53 = vmul.f32 %v206_v52, %v161_v51  ;;  %vm168_vm1 = vweird.f32 %v206_v52 }
 0x1ad   :  { %vm169_vm3 = vmor %vm167_vm2, %vm168_vm1 }
 0x1ae   :  { %v164_v54 = vsub.f32 1.0, %v163_v53 }
 0x1b0   :  { %v165_v56 = vmul.f32 %v206_v52, %v164_v54 }
 0x1b2   :  { %v166_v58 = vadd.f32 %v206_v52, %v165_v56 }
 0x1b4   :  { %v170_v60 = vsel %vm169_vm3, %v206_v52, %v166_v58 }
 0x1b5   :  { %v175_v61 = vsel %vm172_vm5, %v174_v59, %v170_v60 }
 0x1b6   :  { %177 = vst.msk [vmem:[#allocation5] sm:$0xff] %vm176_vm4, %v175_v61 }
 0x1b7   :  { %188 = dma.vmem_to_hbm [thread:$0]  %s184_s5, 128, %s186_s6, [#allocation4]  }
 0x1b8   :  { %257 = dma.done.wait [#allocation4], 128  }
 0x1b9   :  { %258 = vsyncadd [#allocation4], 4294967168 }
 0x1ba   :  { %193 = vsyncpa [#allocation3], 1 }
 0x1bb   :  { %194 = vsyncpa [#allocation4], 1 }

</bundles_post_ra>
